<compile_context>
chip_gen: v7x
topology: tpu7x:2x2x1
jax: 0.10.0
libtpu: 0.0.40
codegen_flags: <defaults>
</compile_context>

<pallas_src>
import functools

import jax
import jax.numpy as jnp
from jax.experimental import pallas as pl
from jax.experimental.pallas import tpu as pltpu

# --- hyperparameters (match module defaults) ---
S_SCALE = 64.0
MARGIN = 0.5
EMBEDDING_SIZE = 32
NUM_CLASS = 16

_NEG_INF = -1e30
_EPS = 1e-12   # F.normalize eps


def _round_up(x, m):
    return (x + m - 1) // m * m


def _metric_kernel(x_ref, w1_ref, b1_ref, wmn_ref, label_ref,
                   emb_ref, logits_ref, loss_ref,
                   *, tb, batch, num_class):
    # ---- backbone: emb = x @ W1 + b1 (bf16 MXU operands, f32 accumulation) ----
    emb = jnp.dot(x_ref[...], w1_ref[...],
                  preferred_element_type=jnp.float32) + b1_ref[...]   # (tb, E_PAD)
    emb_ref[...] = emb

    # ---- row-normalize emb: rsqrt-and-multiply (EUP slot). Padded embedding
    # lanes are exactly zero (zero-padded W1 columns / bias), so the norm over
    # 128 lanes equals the norm over the real E lanes.
    sum_sq = jnp.sum(emb * emb, axis=-1, keepdims=True)
    emb_n = emb * jax.lax.rsqrt(jnp.maximum(sum_sq, _EPS * _EPS))

    # ---- cosine = normalize(emb) @ normalize(Wm).T, contracting the last dim
    # of both operands (no transpose materialized; Wm is pre-normalized).
    cosine = jax.lax.dot_general(
        emb_n, wmn_ref[...], (((1,), (1,)), ((), ())),
        preferred_element_type=jnp.float32)                           # (tb, C_PAD)

    label = label_ref[...]                                            # (tb, 1) i32
    classes = jax.lax.broadcasted_iota(jnp.int32, cosine.shape, 1)
    one_hot = classes == label

    # logits = s*cosine - s*m*one_hot  (scale folded into the select);
    # padded class columns forced to -inf so they vanish from the softmax.
    logits = cosine * S_SCALE - jnp.where(one_hot, S_SCALE * MARGIN, 0.0)
    logits = jnp.where(classes < num_class, logits, _NEG_INF)
    logits_ref[...] = logits

    # ---- CrossEntropyLoss (per-row), padded batch rows masked out ----
    row_max = jnp.max(logits, axis=-1, keepdims=True)
    lse = jnp.log(jnp.sum(jnp.exp(logits - row_max), axis=-1,
                          keepdims=True)) + row_max                   # (tb, 1)
    tgt = jnp.sum(jnp.where(one_hot, logits, 0.0), axis=-1, keepdims=True)
    per_sample = lse - tgt                                            # (tb, 1)
    row = pl.program_id(0) * tb + jax.lax.broadcasted_iota(
        jnp.int32, per_sample.shape, 0)
    per_sample = jnp.where(row < batch, per_sample, 0.0)

    # Lane-dense partial-sum write: one full (1, 8, 128) block per batch tile,
    # independent across tiles (keeps the batch axis truly "parallel").
    loss_ref[...] = jnp.full(loss_ref.shape, jnp.sum(per_sample), jnp.float32)


def softmax_metric_forward(img, label, w1, b1, wm, *, tb=256):
    """Forward of SoftmaxBasedMetricLearning with a label (training path)."""
    B = img.shape[0]
    x_flat = img.reshape(B, -1)                       # NCHW -> (B, C*H*W)
    din = x_flat.shape[1]
    E = w1.shape[1]
    C = wm.shape[0]

    din_p = _round_up(din, 128)
    e_p = _round_up(E, 128)
    c_p = _round_up(C, 128)
    tb = min(tb, _round_up(B, 8))                     # batch tile (multiple of 8)
    n_tiles = pl.cdiv(B, tb)
    b_p = n_tiles * tb

    # bf16 operands for the big x @ W1 matmul; zero padding keeps padded
    # lanes/rows mathematically inert.
    x_p = jnp.zeros((b_p, din_p), jnp.bfloat16).at[:B, :din].set(
        x_flat.astype(jnp.bfloat16))
    w1_p = jnp.zeros((din_p, e_p), jnp.bfloat16).at[:din, :E].set(
        w1.astype(jnp.bfloat16))
    b1_p = jnp.zeros((1, e_p), jnp.float32).at[0, :E].set(b1.astype(jnp.float32))

    # Hoist F.normalize(W_margin) out of the per-tile body (batch-invariant).
    wm_f = wm.astype(jnp.float32)
    wm_n = wm_f / jnp.maximum(
        jnp.sqrt(jnp.sum(wm_f * wm_f, axis=-1, keepdims=True)), _EPS)
    wm_p = jnp.zeros((c_p, e_p), jnp.float32).at[:C, :E].set(wm_n)

    lab_p = jnp.zeros((b_p, 1), jnp.int32).at[:B, 0].set(label.astype(jnp.int32))

    kernel = functools.partial(_metric_kernel, tb=tb, batch=B, num_class=C)

    # Explicit VMEM budget: double-buffered per-tile blocks + resident weights
    # (+ headroom); stays well under v7x's 64 MiB physical VMEM.
    tile_bytes = (tb * din_p * 2 + tb * 4 + tb * e_p * 4 + tb * c_p * 4
                  + 8 * 128 * 4)
    weight_bytes = din_p * e_p * 2 + e_p * 4 + c_p * e_p * 4
    vmem_limit = int(min(max(4 * tile_bytes + 2 * weight_bytes, 8 << 20),
                         48 << 20))

    emb, logits, loss_part = pl.pallas_call(
        kernel,
        out_shape=(
            jax.ShapeDtypeStruct((b_p, e_p), jnp.float32),
            jax.ShapeDtypeStruct((b_p, c_p), jnp.float32),
            jax.ShapeDtypeStruct((n_tiles, 8, 128), jnp.float32),
        ),
        grid_spec=pltpu.PrefetchScalarGridSpec(
            num_scalar_prefetch=0,
            grid=(n_tiles,),
            in_specs=[
                pl.BlockSpec((tb, din_p), lambda i: (i, 0)),    # x tile (pipelined)
                pl.BlockSpec((din_p, e_p), lambda i: (0, 0)),   # W1 (resident)
                pl.BlockSpec((1, e_p), lambda i: (0, 0)),       # b1 (resident)
                pl.BlockSpec((c_p, e_p), lambda i: (0, 0)),     # normalized Wm
                pl.BlockSpec((tb, 1), lambda i: (i, 0)),        # labels per tile
            ],
            out_specs=(
                pl.BlockSpec((tb, e_p), lambda i: (i, 0)),
                pl.BlockSpec((tb, c_p), lambda i: (i, 0)),
                pl.BlockSpec((1, 8, 128), lambda i: (i, 0, 0)),
            ),
        ),
        compiler_params=pltpu.CompilerParams(
            dimension_semantics=("parallel",),
            vmem_limit_bytes=vmem_limit,
        ),
    )(x_p, w1_p, b1_p, wm_p, lab_p)

    loss = jnp.sum(loss_part[:, 0, 0]) / B            # mean over real samples
    return {'loss': loss, 'emb': emb[:B, :E], 'logits': logits[:B, :C]}


def init_params(key, din, embedding_size, num_class):
    k1, k2, k3 = jax.random.split(key, 3)
    # backbone nn.Linear default init: U(-1/sqrt(din), 1/sqrt(din))
    bound = 1.0 / (din ** 0.5)
    w1 = jax.random.uniform(k1, (din, embedding_size), jnp.float32, -bound, bound)
    b1 = jax.random.uniform(k2, (embedding_size,), jnp.float32, -bound, bound)
    # AddMarginProduct weight: xavier_uniform_ on (num_class, embedding_size)
    limit = (6.0 / (embedding_size + num_class)) ** 0.5
    wm = jax.random.uniform(k3, (num_class, embedding_size), jnp.float32,
                            -limit, limit)
    return w1, b1, wm


if __name__ == "__main__":
    key = jax.random.PRNGKey(0)
    k_img, k_lab, k_par = jax.random.split(key, 3)

    B, Cc, H, W = 2, 4, 16, 16
    img = jax.random.normal(k_img, (B, Cc, H, W), jnp.float32)   # NCHW
    label = jax.random.randint(k_lab, (B,), 0, NUM_CLASS, jnp.int32)

    w1, b1, wm = init_params(k_par, Cc * H * W, EMBEDDING_SIZE, NUM_CLASS)

    out = softmax_metric_forward(img, label, w1, b1, wm)
    out = jax.block_until_ready(out)

    assert out['emb'].shape == (B, EMBEDDING_SIZE)
    assert out['logits'].shape == (B, NUM_CLASS)
    assert out['loss'].shape == ()
    assert bool(jnp.isfinite(out['loss']))
    print("KERNEL_OK")
</pallas_src>

<mosaic_0001>
module attributes {stable_mosaic.version = 11 : i64} {
  func.func @_metric_kernel(%arg0: i32, %arg1: memref<8x1024xbf16, #tpu.memory_space<vmem>>, %arg2: memref<1024x128xbf16, #tpu.memory_space<vmem>>, %arg3: memref<1x128xf32, #tpu.memory_space<vmem>>, %arg4: memref<128x128xf32, #tpu.memory_space<vmem>>, %arg5: memref<8x1xi32, #tpu.memory_space<vmem>>, %arg6: memref<8x128xf32, #tpu.memory_space<vmem>>, %arg7: memref<8x128xf32, #tpu.memory_space<vmem>>, %arg8: memref<1x8x128xf32, #tpu.memory_space<vmem>>) attributes {dimension_semantics = [#tpu.dimension_semantics<parallel>], iteration_bounds = array<i64: 1>, scalar_prefetch = 0 : i64, scratch_operands = 0 : i64, tpu.core_type = #tpu.core_type<tc>, window_params = [{transform_indices = @transform_0, window_bounds = array<i64: 8, 1024>}, {pipeline_mode = #tpu.pipeline_mode<synchronous>, transform_indices = @transform_1, window_bounds = array<i64: 1024, 128>}, {pipeline_mode = #tpu.pipeline_mode<synchronous>, transform_indices = @transform_2, window_bounds = array<i64: 1, 128>}, {pipeline_mode = #tpu.pipeline_mode<synchronous>, transform_indices = @transform_3, window_bounds = array<i64: 128, 128>}, {transform_indices = @transform_4, window_bounds = array<i64: 8, 1>}, {transform_indices = @transform_5, window_bounds = array<i64: 8, 128>}, {transform_indices = @transform_6, window_bounds = array<i64: 8, 128>}, {transform_indices = @transform_7, window_bounds = array<i64: 1, 8, 128>}]} {
    %c0 = arith.constant 0 : index
    %c0_0 = arith.constant 0 : index
    %0 = vector.load %arg1[%c0, %c0_0] : memref<8x1024xbf16, #tpu.memory_space<vmem>>, vector<8x1024xbf16>
    %c0_1 = arith.constant 0 : index
    %c0_2 = arith.constant 0 : index
    %1 = vector.load %arg2[%c0_1, %c0_2] : memref<1024x128xbf16, #tpu.memory_space<vmem>>, vector<1024x128xbf16>
    %cst = arith.constant dense<0.000000e+00> : vector<8x128xf32>
    %2 = tpu.matmul %0, %1, %cst {dimension_numbers = #tpu.dot_dimension_numbers<[1], [0], [0], [1], [0, 0, 1, 1], [], []>} : vector<8x1024xbf16>, vector<1024x128xbf16>, vector<8x128xf32> -> vector<8x128xf32>
    %c0_3 = arith.constant 0 : index
    %c0_4 = arith.constant 0 : index
    %3 = vector.load %arg3[%c0_3, %c0_4] : memref<1x128xf32, #tpu.memory_space<vmem>>, vector<1x128xf32>
    %4 = vector.broadcast %3 : vector<1x128xf32> to vector<8x128xf32>
    %5 = arith.addf %2, %4 : vector<8x128xf32>
    %c0_5 = arith.constant 0 : index
    %c0_6 = arith.constant 0 : index
    %6 = vector.load %arg6[%c0_5, %c0_6] : memref<8x128xf32, #tpu.memory_space<vmem>>, vector<8x128xf32>
    tpu.vector_store %arg6[%c0_5, %c0_6], %5 {strides = array<i32>} : memref<8x128xf32, #tpu.memory_space<vmem>>, vector<8x128xf32>,
    %7 = arith.mulf %5, %5 : vector<8x128xf32>
    %cst_7 = arith.constant dense<0.000000e+00> : vector<8xf32>
    %8 = vector.multi_reduction <add>, %7, %cst_7 [1] : vector<8x128xf32> to vector<8xf32>
    %9 = vector.shape_cast %8 : vector<8xf32> to vector<8x1xf32>
    %cst_8 = arith.constant 1.000000e-24 : f32
    %10 = vector.broadcast %cst_8 : f32 to vector<8x1xf32>
    %11 = arith.maximumf %9, %10 : vector<8x1xf32>
    %12 = math.rsqrt %11 : vector<8x1xf32>
    %13 = vector.broadcast %12 : vector<8x1xf32> to vector<8x128xf32>
    %14 = arith.mulf %5, %13 : vector<8x128xf32>
    %c0_9 = arith.constant 0 : index
    %c0_10 = arith.constant 0 : index
    %15 = vector.load %arg4[%c0_9, %c0_10] : memref<128x128xf32, #tpu.memory_space<vmem>>, vector<128x128xf32>
    %cst_11 = arith.constant dense<0.000000e+00> : vector<8x128xf32>
    %16 = tpu.matmul %14, %15, %cst_11 {dimension_numbers = #tpu.dot_dimension_numbers<[1], [1], [0], [0], [0, 0, 1, 0], [], []>} : vector<8x128xf32>, vector<128x128xf32>, vector<8x128xf32> -> vector<8x128xf32>
    %c0_12 = arith.constant 0 : index
    %c0_13 = arith.constant 0 : index
    %17 = vector.load %arg5[%c0_12, %c0_13] : memref<8x1xi32, #tpu.memory_space<vmem>>, vector<8x1xi32>
    %18 = tpu.iota {dimensions = array<i32: 1>} : vector<8x128xi32>
    %19 = vector.broadcast %17 : vector<8x1xi32> to vector<8x128xi32>
    %20 = arith.cmpi eq, %18, %19 : vector<8x128xi32>
    %cst_14 = arith.constant 6.400000e+01 : f32
    %21 = vector.broadcast %cst_14 : f32 to vector<8x128xf32>
    %22 = arith.mulf %16, %21 : vector<8x128xf32>
    %cst_15 = arith.constant 3.200000e+01 : f32
    %cst_16 = arith.constant 0.000000e+00 : f32
    %23 = vector.broadcast %cst_15 : f32 to vector<8x128xf32>
    %24 = vector.broadcast %cst_16 : f32 to vector<8x128xf32>
    %25 = arith.select %20, %23, %24 : vector<8x128xi1>, vector<8x128xf32>
    %26 = arith.subf %22, %25 : vector<8x128xf32>
    %c16_i32 = arith.constant 16 : i32
    %27 = vector.broadcast %c16_i32 : i32 to vector<8x128xi32>
    %28 = arith.cmpi slt, %18, %27 : vector<8x128xi32>
    %cst_17 = arith.constant -1.000000e+30 : f32
    %29 = vector.broadcast %cst_17 : f32 to vector<8x128xf32>
    %30 = arith.select %28, %26, %29 : vector<8x128xi1>, vector<8x128xf32>
    %c0_18 = arith.constant 0 : index
    %c0_19 = arith.constant 0 : index
    %31 = vector.load %arg7[%c0_18, %c0_19] : memref<8x128xf32, #tpu.memory_space<vmem>>, vector<8x128xf32>
    tpu.vector_store %arg7[%c0_18, %c0_19], %30 {strides = array<i32>} : memref<8x128xf32, #tpu.memory_space<vmem>>, vector<8x128xf32>,
    %cst_20 = arith.constant dense<0xFF800000> : vector<8xf32>
    %32 = vector.multi_reduction <maximumf>, %30, %cst_20 [1] : vector<8x128xf32> to vector<8xf32>
    %33 = vector.shape_cast %32 : vector<8xf32> to vector<8x1xf32>
    %34 = vector.broadcast %33 : vector<8x1xf32> to vector<8x128xf32>
    %35 = arith.subf %30, %34 : vector<8x128xf32>
    %36 = math.exp %35 : vector<8x128xf32>
    %cst_21 = arith.constant dense<0.000000e+00> : vector<8xf32>
    %37 = vector.multi_reduction <add>, %36, %cst_21 [1] : vector<8x128xf32> to vector<8xf32>
    %38 = vector.shape_cast %37 : vector<8xf32> to vector<8x1xf32>
    %39 = math.log %38 : vector<8x1xf32>
    %40 = arith.addf %39, %33 : vector<8x1xf32>
    %cst_22 = arith.constant 0.000000e+00 : f32
    %41 = vector.broadcast %cst_22 : f32 to vector<8x128xf32>
    %42 = arith.select %20, %30, %41 : vector<8x128xi1>, vector<8x128xf32>
    %cst_23 = arith.constant dense<0.000000e+00> : vector<8xf32>
    %43 = vector.multi_reduction <add>, %42, %cst_23 [1] : vector<8x128xf32> to vector<8xf32>
    %44 = vector.shape_cast %43 : vector<8xf32> to vector<8x1xf32>
    %45 = arith.subf %40, %44 : vector<8x1xf32>
    %c8_i32 = arith.constant 8 : i32
    %46 = arith.muli %arg0, %c8_i32 : i32
    %47 = tpu.iota {dimensions = array<i32: 0>} : vector<8x1xi32>
    %48 = vector.broadcast %46 : i32 to vector<8x1xi32>
    %49 = arith.addi %48, %47 : vector<8x1xi32>
    %c2_i32 = arith.constant 2 : i32
    %50 = vector.broadcast %c2_i32 : i32 to vector<8x1xi32>
    %51 = arith.cmpi slt, %49, %50 : vector<8x1xi32>
    %cst_24 = arith.constant 0.000000e+00 : f32
    %52 = vector.broadcast %cst_24 : f32 to vector<8x1xf32>
    %53 = arith.select %51, %45, %52 : vector<8x1xi1>, vector<8x1xf32>
    %54 = vector.shape_cast %53 : vector<8x1xf32> to vector<1x8x1xf32>
    %cst_25 = arith.constant dense<0.000000e+00> : vector<1xf32>
    %55 = vector.multi_reduction <add>, %54, %cst_25 [1, 2] : vector<1x8x1xf32> to vector<1xf32>
    %56 = vector.shape_cast %55 : vector<1xf32> to vector<1x1x1xf32>
    %57 = vector.extract %56[0, 0, 0] : f32 from vector<1x1x1xf32>
    %58 = vector.broadcast %57 : f32 to vector<1x8x128xf32>
    %c0_26 = arith.constant 0 : index
    %c0_27 = arith.constant 0 : index
    %c0_28 = arith.constant 0 : index
    %59 = vector.load %arg8[%c0_26, %c0_27, %c0_28] : memref<1x8x128xf32, #tpu.memory_space<vmem>>, vector<1x8x128xf32>
    tpu.vector_store %arg8[%c0_26, %c0_27, %c0_28], %58 {strides = array<i32>} : memref<1x8x128xf32, #tpu.memory_space<vmem>>, vector<1x8x128xf32>,
    return
  }
  func.func @transform_0(%arg0: i32) -> (i32, i32) {
    %c0_i32 = arith.constant 0 : i32
    %c0_i32_0 = arith.constant 0 : i32
    return %arg0, %c0_i32 : i32, i32
  }
  func.func @transform_1(%arg0: i32) -> (i32, i32) {
    %c0_i32 = arith.constant 0 : i32
    %c0_i32_0 = arith.constant 0 : i32
    %c0_i32_1 = arith.constant 0 : i32
    return %c0_i32, %c0_i32_0 : i32, i32
  }
  func.func @transform_2(%arg0: i32) -> (i32, i32) {
    %c0_i32 = arith.constant 0 : i32
    %c0_i32_0 = arith.constant 0 : i32
    %c0_i32_1 = arith.constant 0 : i32
    return %c0_i32, %c0_i32_0 : i32, i32
  }
  func.func @transform_3(%arg0: i32) -> (i32, i32) {
    %c0_i32 = arith.constant 0 : i32
    %c0_i32_0 = arith.constant 0 : i32
    %c0_i32_1 = arith.constant 0 : i32
    return %c0_i32, %c0_i32_0 : i32, i32
  }
  func.func @transform_4(%arg0: i32) -> (i32, i32) {
    %c0_i32 = arith.constant 0 : i32
    %c0_i32_0 = arith.constant 0 : i32
    return %arg0, %c0_i32 : i32, i32
  }
  func.func @transform_5(%arg0: i32) -> (i32, i32) {
    %c0_i32 = arith.constant 0 : i32
    %c0_i32_0 = arith.constant 0 : i32
    return %arg0, %c0_i32 : i32, i32
  }
  func.func @transform_6(%arg0: i32) -> (i32, i32) {
    %c0_i32 = arith.constant 0 : i32
    %c0_i32_0 = arith.constant 0 : i32
    return %arg0, %c0_i32 : i32, i32
  }
  func.func @transform_7(%arg0: i32) -> (i32, i32, i32) {
    %c0_i32 = arith.constant 0 : i32
    %c0_i32_0 = arith.constant 0 : i32
    %c0_i32_1 = arith.constant 0 : i32
    return %arg0, %c0_i32, %c0_i32_0 : i32, i32, i32
  }
}

</mosaic_0001>

<bundles_post_ra>
// kernel: tpu_custom_call.1
= control target key start
LH: loop header
LB: loop body
LE: loop exit
PB: predicated region body
PF: predicated region fallthrough
CT: control target
= control target key end

     0   :  { %13 = vsyncpa [#allocation3], 0  ;;  %s1565_s0 = inlined_call_operand.hbm [shape: bf16[8,1024], index: 0, kind: input, shape index: {}]   ;;  %s1566_s1 = inlined_call_operand.hbm [shape: bf16[1024,128], index: 1, kind: input, shape index: {}]   ;;  %s1567_s2 = inlined_call_operand.vmem [shape: f32[1,128], index: 2, kind: input, shape index: {}]   ;;  %s1568_s3 = inlined_call_operand.hbm [shape: f32[128,128], index: 3, kind: input, shape index: {}]   ;;  %s1569_s4 = inlined_call_operand.vmem [shape: s32[8,1], index: 4, kind: input, shape index: {}]   ;;  %s1570_s5 = inlined_call_operand.hbm [shape: f32[8,128], index: 5, kind: output, shape index: {0}]   ;;  %s1571_s6 = inlined_call_operand.hbm [shape: f32[8,128], index: 6, kind: output, shape index: {1}]   ;;  %s1572_s7 = inlined_call_operand.hbm [shape: f32[1,8,128], index: 7, kind: output, shape index: {2}]  }
   0x1   :  { %14 = vsyncpa [#allocation6], 0 }
   0x2   :  { %15 = vsyncpa [#allocation4], 0 }
   0x3   :  { %16 = vsyncpa [#allocation10], 0  ;;  %s1431_s24 = smov [#allocation5]   ;;  %s1291_s28 = scalar_lea.hbm %s1566_s1, 8192 }
   0x4   :  { %s32_s25 = sshll.u32 %s1431_s24, 4  ;;  %p1292_p0 = scmp.ne.s32.totalorder %s1566_s1, %s1291_s28  ;;  %s33_s25 = int_to_ptr.vmem [resolvable:$true] %s32_s25 }
   0x5   :  { %p1295_p1 = scmp.lt.u32.totalorder %s1291_s28, %s1566_s1 }
   0x7   :  { %p1297_p2 = pnand %p1295_p1, %p1292_p0 }
   0x9   :  { %1300 = shalt.err (!%p1297_p2)
}
   0xa   :  { %s1301_s10 = scalar_lea.vmem %s33_s25, 8192  ;;  %p1306_p4 = scmp.lt.s32.totalorder %s33_s25, %s33_s25 }
   0xb   :  { %p1302_p3 = scmp.ne.s32.totalorder %s33_s25, %s1301_s10  ;;  %p1307_p5 = scmp.lt.s32.totalorder %s1301_s10, %s1301_s10 }
   0xd   :  { %p1308_p6 = por %p1307_p5, %p1306_p4 }
   0xf   :  { %p1309_p7 = pnand %p1308_p6, %p1302_p3 }
  0x11   :  { %1312 = shalt.err (!%p1309_p7)
}
  0x12   :  { %s1432_s11 = smov 64   ;;  %s1433_s12 = smov 4  }
  0x13   :  { %38 = dma.hbm_to_vmem [thread:$0]  %s1566_s1, 8192, %s33_s25, [#allocation6], %s1432_s11, %s1432_s11, %s1433_s12  }
  0x14   :  { %s1434_s15 = smov [#allocation2]   ;;  %s1435_s17 = smov [#allocation7]  }
  0x15   :  { %s23_s16 = sshll.u32 %s1434_s15, 4  ;;  %s46_s18 = sshll.u32 %s1435_s17, 4  ;;  %s24_s16 = int_to_ptr.vmem [resolvable:$true] %s23_s16  ;;  %s47_s18 = int_to_ptr.vmem [resolvable:$true] %s46_s18 }
  0x16   :  { %s1313_s21 = scalar_lea.hbm %s1565_s0, 512 }
  0x17   :  { %p1314_p8 = scmp.ne.s32.totalorder %s1565_s0, %s1313_s21  ;;  %p1317_p9 = scmp.lt.u32.totalorder %s1313_s21, %s1565_s0 }
  0x19   :  { %p1319_p10 = pnand %p1317_p9, %p1314_p8 }
  0x1b   :  { %1322 = shalt.err (!%p1319_p10)
}
  0x1c   :  { %s1323_s1 = scalar_lea.vmem %s24_s16, 512  ;;  %p1328_p12 = scmp.lt.s32.totalorder %s24_s16, %s24_s16 }
  0x1d   :  { %p1324_p11 = scmp.ne.s32.totalorder %s24_s16, %s1323_s1  ;;  %p1329_p13 = scmp.lt.s32.totalorder %s1323_s1, %s1323_s1 }
  0x1f   :  { %p1330_p0 = por %p1329_p13, %p1328_p12 }
  0x21   :  { %p1331_p1 = pnand %p1330_p0, %p1324_p11 }
  0x23   :  { %1334 = shalt.err (!%p1331_p1)
}
  0x24   :  { %26 = dma.hbm_to_vmem [thread:$0]  %s1565_s0, 512, %s24_s16, [#allocation3]  }
  0x25   :  { %s1335_s30 = scalar_lea.hbm %s1568_s3, 2048 }
  0x26   :  { %p1336_p2 = scmp.ne.s32.totalorder %s1568_s3, %s1335_s30  ;;  %p1339_p3 = scmp.lt.u32.totalorder %s1335_s30, %s1568_s3 }
  0x28   :  { %p1341_p4 = pnand %p1339_p3, %p1336_p2 }
  0x2a   :  { %1344 = shalt.err (!%p1341_p4)
}
  0x2b   :  { %s1345_s12 = scalar_lea.vmem %s47_s18, 2048  ;;  %p1350_p6 = scmp.lt.s32.totalorder %s47_s18, %s47_s18 }
  0x2c   :  { %p1346_p5 = scmp.ne.s32.totalorder %s47_s18, %s1345_s12  ;;  %p1351_p7 = scmp.lt.s32.totalorder %s1345_s12, %s1345_s12 }
  0x2e   :  { %p1352_p8 = por %p1351_p7, %p1350_p6 }
  0x30   :  { %p1353_p9 = pnand %p1352_p8, %p1346_p5 }
  0x32   :  { %1356 = shalt.err (!%p1353_p9)
}
  0x33   :  { %s1436_s0 = smov 128   ;;  %s1437_s13 = smov 8  }
  0x34   :  { %52 = dma.hbm_to_vmem [thread:$0]  %s1568_s3, 2048, %s47_s18, [#allocation6], %s1436_s0, %s1436_s0, %s1437_s13  }
  0x35   :  { %1423 = dma.done.wait [#allocation3], 512  }
  0x36   :  { %1424 = vsyncadd [#allocation3], 4294966784 }
  0x37   :  { %1425 = dma.done.wait [#allocation6], 10240  }
  0x38   :  { %1426 = vsyncadd [#allocation6], 4294957056  ;;  %v1213_v0 = vld [vmem:[#allocation5 + $0x40] sm:$0xff]   ;;  %v1215_v2 = vld [vmem:[#allocation5 + $0x48] sm:$0xff]   ;;  %vm1439_vm0 = vmmov 0   ;;  %vm903_vm4 = vcmask 7168  }
  0x39   :  { %v1214_v1 = vld [vmem:[#allocation5] sm:$0xff]   ;;  %1032 = vmatprep.subr.bf16.mxu1 %v1213_v0  ;;  %v1216_v3 = vld [vmem:[#allocation5 + $0x8] sm:$0xff]   ;;  %v1217_v4 = vld [vmem:[#allocation5 + $0x50] sm:$0xff]   ;;  %s1443_s19 = smov [#allocation8]  }
  0x3a   :  { %1033 = vmatpush3.bf16.msra.mxu1 %v1214_v1  ;;  %v1218_v5 = vld [vmem:[#allocation5 + $0x10] sm:$0xff]   ;;  %v1219_v6 = vld [vmem:[#allocation5 + $0x58] sm:$0xff]   ;;  %v1221_v8 = vld [vmem:[#allocation5 + $0x60] sm:$0xff]   ;;  %s922_s20 = sshll.u32 %s1443_s19, 4  ;;  %s923_s20 = int_to_ptr.vmem [resolvable:$true] %s922_s20 }
  0x3b   :  { %1034 = vmatprep.subr.bf16.mxu1 %v1215_v2  ;;  %v1220_v7 = vld [vmem:[#allocation5 + $0x18] sm:$0xff]   ;;  %v1222_v9 = vld [vmem:[#allocation5 + $0x20] sm:$0xff]   ;;  %v1223_v10 = vld [vmem:[#allocation5 + $0x68] sm:$0xff]  }
  0x3c   :  { %v65_v11 = vld [vmem:[#allocation2] sm:$0xff]  ;;  %v1224_v12 = vld [vmem:[#allocation5 + $0x28] sm:$0xff]   ;;  %v1225_v14 = vld [vmem:[#allocation5 + $0x70] sm:$0xff]  }
  0x3d   :  { %v961_v13 = vcombine.high %v65_v11, %v65_v11  ;;  %v1233_v15 = vld [vmem:[#allocation5 + $0x140] sm:$0xff]   ;;  %v1226_v17 = vld [vmem:[#allocation5 + $0x30] sm:$0xff]   ;;  %v1227_v18 = vld [vmem:[#allocation5 + $0x78] sm:$0xff]   ;;  %v960_v26 = vcombine.low %v65_v11, %v65_v11 }
  0x3e   :  { %1035 = vmatpush3.bf16.msra.mxu1 %v1216_v3  ;;  %v1234_v16 = vld [vmem:[#allocation5 + $0x100] sm:$0xff]   ;;  %1076 = vmatprep.subr.bf16.mxu0 %v1233_v15  ;;  %v1237_v19 = vld [vmem:[#allocation5 + $0x148] sm:$0xff]   ;;  %v1228_v21 = vld [vmem:[#allocation5 + $0x38] sm:$0xff]  }
  0x3f   :  { %1036 = vmatprep.subr.bf16.mxu1 %v1217_v4  ;;  %648 = vmatprep.mubr.bf16.mxu1 %v961_v13  ;;  %v1238_v20 = vld [vmem:[#allocation5 + $0x108] sm:$0xff]   ;;  %v1231_v22 = vld [vmem:[#allocation5 + $0xc0] sm:$0xff]   ;;  %v1241_v23 = vld [vmem:[#allocation5 + $0x150] sm:$0xff]  }
  0x40   :  { %1077 = vmatpush3.bf16.msra.mxu0 %v1234_v16  ;;  %v1242_v24 = vld [vmem:[#allocation5 + $0x110] sm:$0xff]   ;;  %v1232_v25 = vld [vmem:[#allocation5 + $0x80] sm:$0xff]   ;;  %v1235_v27 = vld [vmem:[#allocation5 + $0xc8] sm:$0xff]  }
  0x41   :  { %1078 = vmatprep.subr.bf16.mxu0 %v1237_v19  ;;  %v1245_v28 = vld [vmem:[#allocation5 + $0x158] sm:$0xff]   ;;  %v1236_v30 = vld [vmem:[#allocation5 + $0x88] sm:$0xff]   ;;  %v1239_v31 = vld [vmem:[#allocation5 + $0xd0] sm:$0xff]  }
  0x42   :  { %1037 = vmatpush3.bf16.msra.mxu1 %v1218_v5  ;;  %v1246_v29 = vld [vmem:[#allocation5 + $0x118] sm:$0xff]   ;;  %v1249_v32 = vld [vmem:[#allocation5 + $0x160] sm:$0xff]   ;;  %v1240_v34 = vld [vmem:[#allocation5 + $0x90] sm:$0xff]  }
  0x43   :  { %1038 = vmatprep.subr.bf16.mxu1 %v1219_v6  ;;  %v1250_v33 = vld [vmem:[#allocation5 + $0x120] sm:$0xff]   ;;  %v1243_v35 = vld [vmem:[#allocation5 + $0xd8] sm:$0xff]   ;;  %v1253_v36 = vld [vmem:[#allocation5 + $0x168] sm:$0xff]  }
  0x44   :  { %1079 = vmatpush3.bf16.msra.mxu0 %v1238_v20  ;;  %v1254_v37 = vld [vmem:[#allocation5 + $0x128] sm:$0xff]   ;;  %v1244_v38 = vld [vmem:[#allocation5 + $0x98] sm:$0xff]   ;;  %v1247_v39 = vld [vmem:[#allocation5 + $0xe0] sm:$0xff]  }
  0x45   :  { %1080 = vmatprep.subr.bf16.mxu0 %v1241_v23  ;;  %v1257_v40 = vld [vmem:[#allocation5 + $0x170] sm:$0xff]   ;;  %v1248_v42 = vld [vmem:[#allocation5 + $0xa0] sm:$0xff]   ;;  %v1251_v43 = vld [vmem:[#allocation5 + $0xe8] sm:$0xff]  }
  0x46   :  { %1039 = vmatpush3.bf16.msra.mxu1 %v1220_v7  ;;  %v1258_v41 = vld [vmem:[#allocation5 + $0x130] sm:$0xff]   ;;  %v1261_v44 = vld [vmem:[#allocation5 + $0x178] sm:$0xff]   ;;  %v66_v45 = vld [vmem:[#allocation2 + $0x8] sm:$0xff] }
  0x47   :  { %1040 = vmatprep.subr.bf16.mxu1 %v1221_v8  ;;  %v963_v46 = vcombine.high %v66_v45, %v66_v45  ;;  %v1264_v47 = vld [vmem:[#allocation5 + $0x138] sm:$0xff]   ;;  %v67_v48 = vld [vmem:[#allocation2 + $0x10] sm:$0xff]  ;;  %v1252_v51 = vld [vmem:[#allocation5 + $0xa8] sm:$0xff]   ;;  %v962_v57 = vcombine.low %v66_v45, %v66_v45 }
  0x48   :  { %1081 = vmatpush3.bf16.msra.mxu0 %v1242_v24  ;;  %v964_v49 = vcombine.low %v67_v48, %v67_v48  ;;  %v965_v50 = vcombine.high %v67_v48, %v67_v48  ;;  %v1255_v52 = vld [vmem:[#allocation5 + $0xf0] sm:$0xff]   ;;  %v1259_v54 = vld [vmem:[#allocation5 + $0xf8] sm:$0xff]   ;;  %v1265_v56 = vld [vmem:[#allocation5 + $0x1c0] sm:$0xff]  }
  0x49   :  { %1082 = vmatprep.subr.bf16.mxu0 %v1245_v28  ;;  %v1256_v53 = vld [vmem:[#allocation5 + $0xb0] sm:$0xff]   ;;  %v1260_v55 = vld [vmem:[#allocation5 + $0xb8] sm:$0xff]   ;;  %v1268_v58 = vld [vmem:[#allocation5 + $0x180] sm:$0xff]  }
  0x4a   :  { %1041 = vmatpush3.bf16.msra.mxu1 %v1222_v9  ;;  %728 = vmatprep.mubr.bf16.mxu0 %v965_v50  ;;  %v1269_v59 = vld [vmem:[#allocation5 + $0x1c8] sm:$0xff]   ;;  %v68_v60 = vld [vmem:[#allocation2 + $0x18] sm:$0xff]  ;;  %v1271_v63 = vld [vmem:[#allocation5 + $0x1d0] sm:$0xff]  }
  0x4b   :  { %1042 = vmatprep.subr.bf16.mxu1 %v1223_v10  ;;  %v967_v61 = vcombine.high %v68_v60, %v68_v60  ;;  %v1270_v62 = vld [vmem:[#allocation5 + $0x188] sm:$0xff]   ;;  %v1272_v0 = vld [vmem:[#allocation5 + $0x190] sm:$0xff]   ;;  %v1273_v1 = vld [vmem:[#allocation5 + $0x1d8] sm:$0xff]   ;;  %v966_v11 = vcombine.low %v68_v60, %v68_v60 }
  0x4c   :  { %1083 = vmatpush3.bf16.msra.mxu0 %v1246_v29  ;;  %v1274_v2 = vld [vmem:[#allocation5 + $0x198] sm:$0xff]   ;;  %v1275_v3 = vld [vmem:[#allocation5 + $0x1e0] sm:$0xff]   ;;  %v1277_v5 = vld [vmem:[#allocation5 + $0x1e8] sm:$0xff]  }
  0x4d   :  { %1084 = vmatprep.subr.bf16.mxu0 %v1249_v32  ;;  %v1276_v4 = vld [vmem:[#allocation5 + $0x1a0] sm:$0xff]   ;;  %v1278_v6 = vld [vmem:[#allocation5 + $0x1a8] sm:$0xff]   ;;  %v1279_v7 = vld [vmem:[#allocation5 + $0x1f0] sm:$0xff]  }
  0x4e   :  { %1043 = vmatpush3.bf16.msra.mxu1 %v1224_v12  ;;  %v1280_v8 = vld [vmem:[#allocation5 + $0x1b0] sm:$0xff]   ;;  %v1281_v9 = vld [vmem:[#allocation5 + $0x1f8] sm:$0xff]   ;;  %v783_v12 = vld [vmem:[#allocation7] sm:$0xff] }
  0x4f   :  { %1044 = vmatprep.subr.bf16.mxu1 %v1225_v14  ;;  %v1282_v10 = vld [vmem:[#allocation5 + $0x1b8] sm:$0xff]   ;;  %v784_v13 = vld [vmem:[#allocation7 + $0x8] sm:$0xff]  ;;  %v1438_v14 = vmov 0.0|0.0   ;;  %v785_v16 = vld [vmem:[#allocation7 + $0x10] sm:$0xff] }
  0x50   :  { %1085 = vmatpush3.bf16.msra.mxu0 %v1250_v33  ;;  %v1173_v15 = vpack.c.bf16 %v784_v13, %v783_v12  ;;  %v787_v19 = vld [vmem:[#allocation7 + $0x20] sm:$0xff]  ;;  %v788_v20 = vld [vmem:[#allocation7 + $0x28] sm:$0xff]  ;;  %v790_v23 = vld [vmem:[#allocation7 + $0x38] sm:$0xff] }
  0x51   :  { %1086 = vmatprep.subr.bf16.mxu0 %v1253_v36  ;;  %v793_v28 = vld [vmem:[#allocation7 + $0x50] sm:$0xff]  ;;  %v794_v29 = vld [vmem:[#allocation7 + $0x58] sm:$0xff] }
  0x52   :  { %1045 = vmatpush3.bf16.msra.mxu1 %v1226_v17  ;;  %v786_v17 = vld [vmem:[#allocation7 + $0x18] sm:$0xff]  ;;  %v797_v60 = vld [vmem:[#allocation7 + $0x70] sm:$0xff] }
  0x53   :  { %1046 = vmatprep.subr.bf16.mxu1 %v1227_v18  ;;  %v1176_v18 = vpack.c.bf16 %v786_v17, %v785_v16 }
  0x54   :  { %1087 = vmatpush3.bf16.msra.mxu0 %v1254_v37 }
  0x55   :  { %1088 = vmatprep.subr.bf16.mxu0 %v1257_v40 }
  0x56   :  { %1047 = vmatpush3.bf16.msra.mxu1 %v1228_v21  ;;  %v1179_v21 = vpack.c.bf16 %v788_v20, %v787_v19 }
  0x57   :  { %1054 = vmatprep.subr.bf16.mxu1 %v1231_v22  ;;  %v789_v22 = vld [vmem:[#allocation7 + $0x30] sm:$0xff] }
  0x58   :  { %1089 = vmatpush3.bf16.msra.mxu0 %v1258_v41  ;;  %v1182_v24 = vpack.c.bf16 %v790_v23, %v789_v22  ;;  %v959_v41 = vld [vmem:[%s1567_s2] ss:$0 sm:$0xff] }
  0x59   :  { %649 = vmatmul.mubr.bf16.vlgmr.msra.gmra.mrb[0].mxu1 %v960_v26  ;;  %1090 = vmatprep.subr.bf16.mxu0 %v1261_v44  ;;  %v792_v26 = vld [vmem:[#allocation7 + $0x48] sm:$0xff] }
  0x5a   :  { %1055 = vmatpush3.bf16.msra.mxu1 %v1232_v25  ;;  %688 = vmatprep.mubr.bf16.mxu1 %v963_v46  ;;  %v791_v25 = vld [vmem:[#allocation7 + $0x40] sm:$0xff] }
  0x5b   :  { %1056 = vmatprep.subr.bf16.mxu1 %v1235_v27  ;;  %v1185_v27 = vpack.c.bf16 %v792_v26, %v791_v25 }
  0x5c   :  { %1091 = vmatpush3.bf16.msra.mxu0 %v1264_v47 }
  0x5d   :  { %1172 = vmatprep.subr.bf16.mxu0 %v1438_v14 }
  0x5e   :  { %1057 = vmatpush3.bf16.msra.mxu1 %v1236_v30  ;;  %v1188_v30 = vpack.c.bf16 %v794_v29, %v793_v28 }
  0x5f   :  { %1058 = vmatprep.subr.bf16.mxu1 %v1239_v31  ;;  %729 = vmatmul.mubr.bf16.vlgmr.msra.gmra.mrb[0].mxu0 %v964_v49 }
  0x62   :  { %1059 = vmatpush3.bf16.msra.mxu1 %v1240_v34 }
  0x63   :  { %1060 = vmatprep.subr.bf16.mxu1 %v1243_v35 }
  0x65   :  { %1174 = vmatpush3.bf16.xpose.msra.mxu0 %v1173_v15 }
  0x66   :  { %1061 = vmatpush3.bf16.msra.mxu1 %v1244_v38  ;;  %1175 = vmatprep.subr.bf16.mxu0 %v1438_v14 }
  0x67   :  { %1062 = vmatprep.subr.bf16.mxu1 %v1247_v39 }
  0x6a   :  { %1063 = vmatpush3.bf16.msra.mxu1 %v1248_v42 }
  0x6b   :  { %1064 = vmatprep.subr.bf16.mxu1 %v1251_v43 }
  0x6d   :  { %1177 = vmatpush3.bf16.xpose.msra.mxu0 %v1176_v18 }
  0x6e   :  { %1065 = vmatpush3.bf16.msra.mxu1 %v1252_v51  ;;  %1178 = vmatprep.subr.bf16.mxu0 %v1438_v14 }
  0x6f   :  { %1066 = vmatprep.subr.bf16.mxu1 %v1255_v52 }
  0x72   :  { %1067 = vmatpush3.bf16.msra.mxu1 %v1256_v53 }
  0x73   :  { %1068 = vmatprep.subr.bf16.mxu1 %v1259_v54 }
  0x75   :  { %1180 = vmatpush3.bf16.xpose.msra.mxu0 %v1179_v21 }
  0x76   :  { %1069 = vmatpush3.bf16.msra.mxu1 %v1260_v55  ;;  %1181 = vmatprep.subr.bf16.mxu0 %v1438_v14 }
  0x77   :  { %1098 = vmatprep.subr.bf16.mxu1 %v1265_v56 }
  0x79   :  { %689 = vmatmul.mubr.bf16.vlgmr.msra.gmra.mrb[4].mxu1 %v962_v57  ;;  %v795_v57 = vld [vmem:[#allocation7 + $0x60] sm:$0xff] }
  0x7a   :  { %1099 = vmatpush3.bf16.msra.mxu1 %v1268_v58  ;;  %768 = vmatprep.mubr.bf16.mxu1 %v967_v61  ;;  %v796_v58 = vld [vmem:[#allocation7 + $0x68] sm:$0xff]  ;;  %v798_v61 = vld [vmem:[#allocation7 + $0x78] sm:$0xff] }
  0x7b   :  { %1100 = vmatprep.subr.bf16.mxu1 %v1269_v59  ;;  %v1191_v59 = vpack.c.bf16 %v796_v58, %v795_v57 }
  0x7d   :  { %1183 = vmatpush3.bf16.xpose.msra.mxu0 %v1182_v24 }
  0x7e   :  { %1101 = vmatpush3.bf16.msra.mxu1 %v1270_v62  ;;  %1184 = vmatprep.subr.bf16.mxu0 %v1438_v14  ;;  %v1440_v62 = vmov 0.0  }
  0x7f   :  { %1102 = vmatprep.subr.bf16.mxu1 %v1271_v63  ;;  %1169 = vmatprep.mubr.msk.f32.mxu0 %vm1439_vm0, %v1440_v62  ;;  %v1194_v63 = vpack.c.bf16 %v798_v61, %v797_v60 }
  0x82   :  { %1103 = vmatpush3.bf16.msra.mxu1 %v1272_v0  ;;  %v869_v0 = vld [vmem:[%s1569_s4] sm:$0xff]  ;;  %s1442_s4 = smov [#allocation9]  }
  0x83   :  { %1104 = vmatprep.subr.bf16.mxu1 %v1273_v1  ;;  %v1441_v1 = vmov 0   ;;  %s932_s18 = sshll.u32 %s1442_s4, 4  ;;  %s933_s18 = int_to_ptr.vmem [resolvable:$true] %s932_s18 }
  0x84   :  { %1212 = vset.pattern.permute.xlu0 %v1441_v1  ;;  %s1357_s21 = scalar_lea.vmem %s933_s18, 128  ;;  %p1362_p11 = scmp.lt.s32.totalorder %s933_s18, %s933_s18 }
  0x85   :  { %1186 = vmatpush3.bf16.xpose.msra.mxu0 %v1185_v27  ;;  %p1358_p10 = scmp.ne.s32.totalorder %s933_s18, %s1357_s21  ;;  %p1363_p12 = scmp.lt.s32.totalorder %s1357_s21, %s1357_s21 }
  0x86   :  { %1105 = vmatpush3.bf16.msra.mxu1 %v1274_v2  ;;  %1187 = vmatprep.subr.bf16.mxu0 %v1438_v14 }
  0x87   :  { %1106 = vmatprep.subr.bf16.mxu1 %v1275_v3  ;;  %p1364_p13 = por %p1363_p12, %p1362_p11 }
  0x89   :  { %p1365_p0 = pnand %p1364_p13, %p1358_p10 }
  0x8a   :  { %1107 = vmatpush3.bf16.msra.mxu1 %v1276_v4 }
  0x8b   :  { %1108 = vmatprep.subr.bf16.mxu1 %v1277_v5 }
  0x8d   :  { %1189 = vmatpush3.bf16.xpose.msra.mxu0 %v1188_v30 }
  0x8e   :  { %1109 = vmatpush3.bf16.msra.mxu1 %v1278_v6  ;;  %1190 = vmatprep.subr.bf16.mxu0 %v1438_v14  ;;  %v870_v6 = vlaneseq }
  0x8f   :  { %1110 = vmatprep.subr.bf16.mxu1 %v1279_v7 }
  0x90   :  { %v871_v7 = vand.u32 127, %v870_v6  ;;  %v898_v22 = vshrl.u32 %v870_v6, 7 }
  0x92   :  { %1111 = vmatpush3.bf16.msra.mxu1 %v1280_v8  ;;  %vm879_vm2 = vcmp.lt.s32.totalorder %v871_v7, 16  ;;  %vm901_vm3 = vcmp.lt.s32.totalorder %v898_v22, 2 }
  0x93   :  { %1112 = vmatprep.subr.bf16.mxu1 %v1281_v9 }
  0x95   :  { %1192 = vmatpush3.bf16.xpose.msra.mxu0 %v1191_v59 }
  0x96   :  { %1113 = vmatpush3.bf16.msra.mxu1 %v1282_v10  ;;  %1193 = vmatprep.subr.bf16.mxu0 %v1438_v14 }
  0x99   :  { %769 = vmatmul.mubr.bf16.vlgmr.msra.gmra.mrb[8].mxu1 %v966_v11 }
  0x9d   :  { %1195 = vmatpush3.bf16.xpose.msra.mxu0 %v1194_v63 }
 0x12c   :  { %v1048_v31 = vpop.f32.mrb[0].mxu1 }
 0x12d   :  { %v1049_v32 = vpop.f32.mrb[1].mxu1 }
 0x12e   :  { %v1050_v33 = vadd.f32 %v1049_v32, %v1048_v31  ;;  %v1051_v34 = vpop.f32.mrb[2].mxu1 }
 0x12f   :  { %v1052_v35 = vpop.f32.mrb[3].mxu1 }
 0x130   :  { %v651_v44 = vadd.f32 %v1050_v33, %v959_v41 }
 0x132   :  { %v1092_v36 = vpop.f32.mrb[0].mxu0 }
 0x133   :  { %v1093_v37 = vpop.f32.mrb[1].mxu0 }
 0x134   :  { %v1094_v38 = vadd.f32 %v1093_v37, %v1092_v36  ;;  %v1095_v39 = vpop.f32.mrb[2].mxu0 }
 0x135   :  { %v1096_v40 = vpop.f32.mrb[3].mxu0 }
 0x14c   :  { %v1070_v42 = vpop.f32.mrb[4].mxu1 }
 0x14d   :  { %v1071_v43 = vpop.f32.mrb[5].mxu1 }
 0x14e   :  { %v1072_v45 = vadd.f32 %v1071_v43, %v1070_v42  ;;  %v1073_v46 = vpop.f32.mrb[6].mxu1 }
 0x14f   :  { %v1074_v47 = vpop.f32.mrb[7].mxu1 }
 0x150   :  { %v691_v48 = vadd.f32 %v1072_v45, %v651_v44 }
 0x152   :  { %v731_v49 = vadd.f32 %v1094_v38, %v691_v48 }
 0x16c   :  { %v1114_v50 = vpop.f32.mrb[8].mxu1 }
 0x16d   :  { %v1115_v51 = vpop.f32.mrb[9].mxu1 }
 0x16e   :  { %v1116_v52 = vadd.f32 %v1115_v51, %v1114_v50  ;;  %v1117_v53 = vpop.f32.mrb[10].mxu1 }
 0x16f   :  { %v1118_v54 = vpop.f32.mrb[11].mxu1 }
 0x170   :  { %v771_v55 = vadd.f32 %v1116_v52, %v731_v49 }
 0x172   :  { %776 = vst [vmem:[#allocation8] sm:$0xff] %v771_v55  ;;  %v777_v56 = vmul.f32 %v771_v55, %v771_v55 }
 0x174   :  { %778 = vadd.xlane.f32.xlu0 %v777_v56 }
 0x18a   :  { %873 = vperm.xlu0 %1212, %v869_v0  }
 0x201   :  { %v779_v2 = vpop.xlane.xlu0 %778 }
 0x202   :  { %v780_v3 = vmax.f32 %v779_v2, 1e-24 }
 0x204   :  { %1285 = vrsqrt.f32 %v780_v3 }
 0x209   :  { %v874_v8 = vpop.permute.xlu0 %873 }
 0x20a   :  { %vm875_vm1 = vcmp.eq.s32.totalorder %v871_v7, %v874_v8 }
 0x20b   :  { %v877_v10 = vsel %vm875_vm1, 32.0, %v1440_v62 }
 0x20e   :  { %v1286_v4 = vpop.eup %1285 }
 0x20f   :  { %v782_v5 = vmul.f32 %v1286_v4, %v771_v55 }
 0x211   :  { %1170 = vmatmul.mubr.f32.vlgmr.msra.gmra.mrb[4].mxu0 %v782_v5 }
 0x2e4   :  { %v865_v9 = vpop.f32.mrb[4].mxu0 }
 0x2e5   :  { %v876_v11 = vmul.f32 64.0, %v865_v9  ;;  %v1171_v12 = vpop.f32.mrb[5].mxu0 }
 0x2e7   :  { %v878_v13 = vsub.f32 %v876_v11, %v877_v10 }
 0x2e9   :  { %v880_v14 = vsel %vm879_vm2, %v878_v13, -1e+30 }
 0x2ea   :  { %882 = vmax.xlane.f32.xlu1 %v880_v14  ;;  %881 = vst [vmem:[#allocation9] sm:$0xff] %v880_v14  ;;  %v892_v19 = vsel %vm875_vm1, %v880_v14, 0.0 }
 0x377   :  { %v883_v15 = vpop.xlane.xlu1 %882 }
 0x378   :  { %v884_v16 = vsub.f32 %v880_v14, %v883_v15 }
 0x37a   :  { %v885_v17 = vmul.f32 1.442695, %v884_v16 }
 0x37c   :  { %1287 = vpow2.f32 %v885_v17 }
 0x386   :  { %v1288_v18 = vpop.eup %1287 }
 0x387   :  { %887 = vadd.xlane.f32.xlu1 %v1288_v18 }
 0x38b   :  { %893 = vadd.xlane.f32.xlu1 %v892_v19 }
 0x414   :  { %v888_v20 = vpop.xlane.xlu1 %887 }
 0x415   :  { %1289 = vlog2.f32 %v888_v20 }
 0x418   :  { %v894_v25 = vpop.xlane.xlu1 %893 }
 0x41f   :  { %v1290_v21 = vpop.eup %1289 }
 0x420   :  { %v890_v23 = vmul.f32 0.6931472, %v1290_v21 }
 0x422   :  { %v891_v24 = vadd.f32 %v890_v23, %v883_v15 }
 0x424   :  { %v895_v26 = vsub.f32 %v891_v24, %v894_v25 }
 0x426   :  { %v902_v27 = vsel %vm901_vm3, %v895_v26, 0.0 }
 0x427   :  { %v904_v28 = vsel %vm903_vm4, %v902_v27, 0.0 }
 0x428   :  { %905 = vadd.xlane.f32.xlu1 %v904_v28 }
 0x429   :  { %1368 = shalt.err (!%p1365_p0)
}
 0x42a   :  { %s1369_s24 = scalar_lea.hbm %s1571_s6, 128 }
 0x42b   :  { %p1370_p1 = scmp.ne.s32.totalorder %s1571_s6, %s1369_s24  ;;  %p1373_p2 = scmp.lt.u32.totalorder %s1369_s24, %s1571_s6 }
 0x42d   :  { %p1375_p3 = pnand %p1373_p2, %p1370_p1 }
 0x42f   :  { %1378 = shalt.err (!%p1375_p3)
}
 0x430   :  { %935 = dma.vmem_to_hbm [thread:$0]  %s933_s18, 128, %s1571_s6, [#allocation10]  }
 0x431   :  { %s1379_s30 = scalar_lea.vmem %s923_s20, 128  ;;  %p1384_p5 = scmp.lt.s32.totalorder %s923_s20, %s923_s20 }
 0x432   :  { %p1380_p4 = scmp.ne.s32.totalorder %s923_s20, %s1379_s30  ;;  %p1385_p6 = scmp.lt.s32.totalorder %s1379_s30, %s1379_s30 }
 0x434   :  { %p1386_p7 = por %p1385_p6, %p1384_p5 }
 0x436   :  { %p1387_p8 = pnand %p1386_p7, %p1380_p4 }
 0x438   :  { %1390 = shalt.err (!%p1387_p8)
}
 0x439   :  { %s1391_s10 = scalar_lea.hbm %s1570_s5, 128 }
 0x43a   :  { %p1392_p9 = scmp.ne.s32.totalorder %s1570_s5, %s1391_s10  ;;  %p1395_p10 = scmp.lt.u32.totalorder %s1391_s10, %s1570_s5 }
 0x43c   :  { %p1397_p11 = pnand %p1395_p10, %p1392_p9 }
 0x43e   :  { %1400 = shalt.err (!%p1397_p11)
}
 0x43f   :  { %925 = dma.vmem_to_hbm [thread:$0]  %s923_s20, 128, %s1570_s5, [#allocation4]  }
 0x440   :  { %s1444_s15 = smov [#allocation11]  }
 0x441   :  { %s942_s3 = sshll.u32 %s1444_s15, 4  ;;  %s943_s3 = int_to_ptr.vmem [resolvable:$true] %s942_s3 }
 0x442   :  { %s1401_s2 = scalar_lea.vmem %s943_s3, 128  ;;  %p1406_p13 = scmp.lt.s32.totalorder %s943_s3, %s943_s3 }
 0x443   :  { %p1402_p12 = scmp.ne.s32.totalorder %s943_s3, %s1401_s2  ;;  %p1407_p0 = scmp.lt.s32.totalorder %s1401_s2, %s1401_s2 }
 0x445   :  { %p1408_p1 = por %p1407_p0, %p1406_p13 }
 0x447   :  { %p1409_p2 = pnand %p1408_p1, %p1402_p12 }
 0x4b5   :  { %v906_v29 = vpop.xlane.xlu1 %905 }
 0x4b6   :  { %v907_v30 = vrot.slane %v906_v29, 4 }
 0x4b8   :  { %v908_v31 = vadd.f32 %v907_v30, %v906_v29 }
 0x4ba   :  { %v909_v32 = vrot.slane %v908_v31, 2 }
 0x4bc   :  { %v910_v33 = vadd.f32 %v909_v32, %v908_v31 }
 0x4be   :  { %v911_v34 = vrot.slane %v910_v33, 1 }
 0x4c0   :  { %v912_v35 = vadd.f32 %v911_v34, %v910_v33 }
 0x4c2   :  { %1196 = vpush %v912_v35 }
 0x4f3   :  { %s1197_s16 = spop %1196 }
 0x4f4   :  { %v914_v36 = vstv %s1197_s16 }
 0x4f5   :  { %915 = vst [vmem:[#allocation11] sm:$0xff] %v914_v36 }
 0x4f6   :  { %1412 = shalt.err (!%p1409_p2)
}
 0x4f7   :  { %s1413_s4 = scalar_lea.hbm %s1572_s7, 128 }
 0x4f8   :  { %p1414_p3 = scmp.ne.s32.totalorder %s1572_s7, %s1413_s4  ;;  %p1417_p4 = scmp.lt.u32.totalorder %s1413_s4, %s1572_s7 }
 0x4fa   :  { %p1419_p5 = pnand %p1417_p4, %p1414_p3 }
 0x4fc   :  { %1422 = shalt.err (!%p1419_p5)
}
 0x4fd   :  { %945 = dma.vmem_to_hbm [thread:$0]  %s943_s3, 128, %s1572_s7, [#allocation10]  }
 0x4fe   :  { %1427 = dma.done.wait [#allocation4], 128  }
 0x4ff   :  { %1428 = vsyncadd [#allocation4], 4294967168 }
 0x500   :  { %1429 = dma.done.wait [#allocation10], 256  }
 0x501   :  { %1430 = vsyncadd [#allocation10], 4294967040 }
 0x502   :  { %955 = vsyncpa [#allocation3], 1 }
 0x503   :  { %956 = vsyncpa [#allocation6], 1 }
 0x504   :  { %957 = vsyncpa [#allocation4], 1 }
 0x505   :  { %958 = vsyncpa [#allocation10], 1 }

</bundles_post_ra>
